<compile_context>
chip_gen: v6e
topology: v6e:2x2x1
jax: 0.10.0
libtpu: 0.0.40
codegen_flags: <defaults>
</compile_context>

<pallas_src>
import functools

import jax
import jax.numpy as jnp
from jax.experimental import pallas as pl
from jax.experimental.pallas import tpu as pltpu

BN_EPS = 1e-5

# (in_size, out_size, activation)
LAYER_CONFIGS = [(32, 64, "ReLU"), (64, 64, "Swish"), (64, 32, "Tanh")]
WITH_BATCH_NORM = True
WITH_RESIDUAL = True


def _apply_activation(name, x):
    if name == "ReLU":
        return jnp.maximum(x, 0.0)
    if name == "Swish":          # x * sigmoid(x)
        return x * jax.nn.sigmoid(x)
    if name == "Tanh":
        return jnp.tanh(x)
    if name == "Sigmoid":
        return jax.nn.sigmoid(x)
    if name == "LeakyReLU":
        return jnp.where(x >= 0.0, x, 0.01 * x)
    raise ValueError(f"Activation {name} not supported in this kernel")


def make_fused_kernel(layer_configs, with_batch_norm, with_residual):
    """One kernel running every ConfigurableBlock back-to-back in VMEM.

    Ref layout: (x_ref, [wcat, bcat, gamma, beta] * n_layers, o_ref).
    `wcat` is W (in,out) concatenated with the projection PW along the output
    dim when a projection exists, so each block does a single MXU matmul.
    """

    def kernel(*refs):
        x_ref = refs[0]
        o_ref = refs[-1]
        param_refs = refs[1:-1]

        h = x_ref[...]                     # f32 (B, d_in0)
        idx = 0
        for (d_in, d_out, act) in layer_configs:
            wcat = param_refs[idx][...]
            bcat = param_refs[idx + 1][...]
            gamma = param_refs[idx + 2][...]
            beta = param_refs[idx + 3][...]
            idx += 4

            has_proj = with_residual and (d_in != d_out)

            # Single fused matmul: x @ [W | PW]  (MXU), then split.
            full = jnp.dot(h, wcat, preferred_element_type=jnp.float32) + bcat
            out = full[:, :d_out]

            # BatchNorm1d, training-mode semantics (biased batch statistics).
            if with_batch_norm:
                mean = jnp.mean(out, axis=0, keepdims=True)
                var = jnp.mean(out * out, axis=0, keepdims=True) - mean * mean
                out = (out - mean) * jax.lax.rsqrt(var + BN_EPS)
                out = out * gamma + beta

            out = _apply_activation(act, out)

            # Residual (+ projection Linear if in_size != out_size).
            if with_residual:
                res = full[:, d_out:] if has_proj else h
                out = out + res

            h = out

        o_ref[...] = h

    return kernel


def init_params(key):
    """Deterministic init matching the PyTorch module's parameter shapes.

    Per layer: wcat (in, out [+ out if projection]), bcat (1, out [+ out]),
    gamma (1, out), beta (1, out).
    """
    params = []
    for (d_in, d_out, _act) in LAYER_CONFIGS:
        key, kw, kb, kpw, kpb = jax.random.split(key, 5)
        scale = 1.0 / jnp.sqrt(jnp.float32(d_in))
        w = jax.random.uniform(kw, (d_in, d_out), jnp.float32, -scale, scale)
        b = jax.random.uniform(kb, (1, d_out), jnp.float32, -scale, scale)
        has_proj = WITH_RESIDUAL and d_in != d_out
        if has_proj:
            pw = jax.random.uniform(kpw, (d_in, d_out), jnp.float32,
                                    -scale, scale)
            pb = jax.random.uniform(kpb, (1, d_out), jnp.float32,
                                    -scale, scale)
            wcat = jnp.concatenate([w, pw], axis=1)   # (d_in, 2*d_out)
            bcat = jnp.concatenate([b, pb], axis=1)   # (1, 2*d_out)
        else:
            wcat, bcat = w, b
        params.append({
            "wcat": wcat,
            "bcat": bcat,
            # BatchNorm1d affine params (PyTorch default init).
            "gamma": jnp.ones((1, d_out), jnp.float32),
            "beta": jnp.zeros((1, d_out), jnp.float32),
        })
    return params


@jax.jit
def configurable_nn_forward(x, params):
    inputs = [x]
    for p in params:
        inputs += [p["wcat"], p["bcat"], p["gamma"], p["beta"]]

    B = x.shape[0]
    d_out_final = LAYER_CONFIGS[-1][1]

    kernel = make_fused_kernel(LAYER_CONFIGS, WITH_BATCH_NORM, WITH_RESIDUAL)

    # No grid: the whole (tiny) problem is one VMEM-resident block.
    # TODO(synk): for large batches, add a batch-tiled "parallel" grid with a
    # separate BN-stats pass (and bf16 MXU operands on v6e/v7x).
    return pl.pallas_call(
        kernel,
        out_shape=jax.ShapeDtypeStruct((B, d_out_final), jnp.float32),
        in_specs=[pl.BlockSpec(memory_space=pltpu.MemorySpace.VMEM)
                  for _ in inputs],
        out_specs=pl.BlockSpec(memory_space=pltpu.MemorySpace.VMEM),
    )(*inputs)


def _reference_forward(x, params):
    """Pure-JAX reference for correctness checking."""
    h = x
    for (d_in, d_out, act), p in zip(LAYER_CONFIGS, params):
        has_proj = WITH_RESIDUAL and d_in != d_out
        full = h @ p["wcat"] + p["bcat"]
        out = full[:, :d_out]
        if WITH_BATCH_NORM:
            mean = jnp.mean(out, axis=0, keepdims=True)
            var = jnp.mean((out - mean) ** 2, axis=0, keepdims=True)
            out = (out - mean) / jnp.sqrt(var + BN_EPS)
            out = out * p["gamma"] + p["beta"]
        out = _apply_activation(act, out)
        if WITH_RESIDUAL:
            res = full[:, d_out:] if has_proj else h
            out = out + res
        h = out
    return h


if __name__ == "__main__":
    key = jax.random.PRNGKey(0)
    key, kx, kp = jax.random.split(key, 3)

    batch = 8
    x = jax.random.normal(kx, (batch, LAYER_CONFIGS[0][0]), jnp.float32)
    params = init_params(kp)

    y = configurable_nn_forward(x, params)
    jax.block_until_ready(y)

    assert y.shape == (batch, LAYER_CONFIGS[-1][1])
    assert jnp.all(jnp.isfinite(y))

    y_ref = _reference_forward(x, params)
    assert jnp.allclose(y, y_ref, atol=1e-4, rtol=1e-4)

    print("KERNEL_OK")
</pallas_src>

<mosaic_0001>
module attributes {stable_mosaic.version = 11 : i64} {
  func.func @kernel(%arg0: memref<8x32xf32, #tpu.memory_space<vmem>>, %arg1: memref<32x128xf32, #tpu.memory_space<vmem>>, %arg2: memref<1x128xf32, #tpu.memory_space<vmem>>, %arg3: memref<1x64xf32, #tpu.memory_space<vmem>>, %arg4: memref<1x64xf32, #tpu.memory_space<vmem>>, %arg5: memref<64x64xf32, #tpu.memory_space<vmem>>, %arg6: memref<1x64xf32, #tpu.memory_space<vmem>>, %arg7: memref<1x64xf32, #tpu.memory_space<vmem>>, %arg8: memref<1x64xf32, #tpu.memory_space<vmem>>, %arg9: memref<64x64xf32, #tpu.memory_space<vmem>>, %arg10: memref<1x64xf32, #tpu.memory_space<vmem>>, %arg11: memref<1x32xf32, #tpu.memory_space<vmem>>, %arg12: memref<1x32xf32, #tpu.memory_space<vmem>>, %arg13: memref<8x32xf32, #tpu.memory_space<vmem>>) attributes {dimension_semantics = [], scalar_prefetch = 0 : i64, scratch_operands = 0 : i64, tpu.core_type = #tpu.core_type<tc>} {
    %c0 = arith.constant 0 : index
    %c0_0 = arith.constant 0 : index
    %0 = vector.load %arg0[%c0, %c0_0] : memref<8x32xf32, #tpu.memory_space<vmem>>, vector<8x32xf32>
    %c0_1 = arith.constant 0 : index
    %c0_2 = arith.constant 0 : index
    %1 = vector.load %arg1[%c0_1, %c0_2] : memref<32x128xf32, #tpu.memory_space<vmem>>, vector<32x128xf32>
    %c0_3 = arith.constant 0 : index
    %c0_4 = arith.constant 0 : index
    %2 = vector.load %arg2[%c0_3, %c0_4] : memref<1x128xf32, #tpu.memory_space<vmem>>, vector<1x128xf32>
    %c0_5 = arith.constant 0 : index
    %c0_6 = arith.constant 0 : index
    %3 = vector.load %arg3[%c0_5, %c0_6] : memref<1x64xf32, #tpu.memory_space<vmem>>, vector<1x64xf32>
    %c0_7 = arith.constant 0 : index
    %c0_8 = arith.constant 0 : index
    %4 = vector.load %arg4[%c0_7, %c0_8] : memref<1x64xf32, #tpu.memory_space<vmem>>, vector<1x64xf32>
    %cst = arith.constant dense<0.000000e+00> : vector<8x128xf32>
    %5 = tpu.matmul %0, %1, %cst {dimension_numbers = #tpu.dot_dimension_numbers<[1], [0], [0], [1], [0, 0, 1, 1], [], []>} : vector<8x32xf32>, vector<32x128xf32>, vector<8x128xf32> -> vector<8x128xf32>
    %6 = vector.broadcast %2 : vector<1x128xf32> to vector<8x128xf32>
    %7 = arith.addf %5, %6 : vector<8x128xf32>
    %8 = vector.extract_strided_slice %7 {offsets = [0, 0], sizes = [8, 64], strides = [1, 1]} : vector<8x128xf32> to vector<8x64xf32>
    %cst_9 = arith.constant dense<0.000000e+00> : vector<64xf32>
    %9 = vector.multi_reduction <add>, %8, %cst_9 [0] : vector<8x64xf32> to vector<64xf32>
    %10 = vector.shape_cast %9 : vector<64xf32> to vector<1x64xf32>
    %cst_10 = arith.constant 8.000000e+00 : f32
    %11 = vector.broadcast %cst_10 : f32 to vector<1x64xf32>
    %12 = arith.divf %10, %11 : vector<1x64xf32>
    %13 = arith.mulf %8, %8 : vector<8x64xf32>
    %cst_11 = arith.constant dense<0.000000e+00> : vector<64xf32>
    %14 = vector.multi_reduction <add>, %13, %cst_11 [0] : vector<8x64xf32> to vector<64xf32>
    %15 = vector.shape_cast %14 : vector<64xf32> to vector<1x64xf32>
    %cst_12 = arith.constant 8.000000e+00 : f32
    %16 = vector.broadcast %cst_12 : f32 to vector<1x64xf32>
    %17 = arith.divf %15, %16 : vector<1x64xf32>
    %18 = arith.mulf %12, %12 : vector<1x64xf32>
    %19 = arith.subf %17, %18 : vector<1x64xf32>
    %20 = vector.broadcast %12 : vector<1x64xf32> to vector<8x64xf32>
    %21 = arith.subf %8, %20 : vector<8x64xf32>
    %cst_13 = arith.constant 9.99999974E-6 : f32
    %22 = vector.broadcast %cst_13 : f32 to vector<1x64xf32>
    %23 = arith.addf %19, %22 : vector<1x64xf32>
    %24 = math.rsqrt %23 : vector<1x64xf32>
    %25 = vector.broadcast %24 : vector<1x64xf32> to vector<8x64xf32>
    %26 = arith.mulf %21, %25 : vector<8x64xf32>
    %27 = vector.broadcast %3 : vector<1x64xf32> to vector<8x64xf32>
    %28 = arith.mulf %26, %27 : vector<8x64xf32>
    %29 = vector.broadcast %4 : vector<1x64xf32> to vector<8x64xf32>
    %30 = arith.addf %28, %29 : vector<8x64xf32>
    %cst_14 = arith.constant 0.000000e+00 : f32
    %31 = vector.broadcast %cst_14 : f32 to vector<8x64xf32>
    %32 = arith.maximumf %30, %31 : vector<8x64xf32>
    %33 = vector.extract_strided_slice %7 {offsets = [0, 64], sizes = [8, 64], strides = [1, 1]} : vector<8x128xf32> to vector<8x64xf32>
    %34 = arith.addf %32, %33 : vector<8x64xf32>
    %c0_15 = arith.constant 0 : index
    %c0_16 = arith.constant 0 : index
    %35 = vector.load %arg5[%c0_15, %c0_16] : memref<64x64xf32, #tpu.memory_space<vmem>>, vector<64x64xf32>
    %c0_17 = arith.constant 0 : index
    %c0_18 = arith.constant 0 : index
    %36 = vector.load %arg6[%c0_17, %c0_18] : memref<1x64xf32, #tpu.memory_space<vmem>>, vector<1x64xf32>
    %c0_19 = arith.constant 0 : index
    %c0_20 = arith.constant 0 : index
    %37 = vector.load %arg7[%c0_19, %c0_20] : memref<1x64xf32, #tpu.memory_space<vmem>>, vector<1x64xf32>
    %c0_21 = arith.constant 0 : index
    %c0_22 = arith.constant 0 : index
    %38 = vector.load %arg8[%c0_21, %c0_22] : memref<1x64xf32, #tpu.memory_space<vmem>>, vector<1x64xf32>
    %cst_23 = arith.constant dense<0.000000e+00> : vector<8x64xf32>
    %39 = tpu.matmul %34, %35, %cst_23 {dimension_numbers = #tpu.dot_dimension_numbers<[1], [0], [0], [1], [0, 0, 1, 1], [], []>} : vector<8x64xf32>, vector<64x64xf32>, vector<8x64xf32> -> vector<8x64xf32>
    %40 = vector.broadcast %36 : vector<1x64xf32> to vector<8x64xf32>
    %41 = arith.addf %39, %40 : vector<8x64xf32>
    %cst_24 = arith.constant dense<0.000000e+00> : vector<64xf32>
    %42 = vector.multi_reduction <add>, %41, %cst_24 [0] : vector<8x64xf32> to vector<64xf32>
    %43 = vector.shape_cast %42 : vector<64xf32> to vector<1x64xf32>
    %cst_25 = arith.constant 8.000000e+00 : f32
    %44 = vector.broadcast %cst_25 : f32 to vector<1x64xf32>
    %45 = arith.divf %43, %44 : vector<1x64xf32>
    %46 = arith.mulf %41, %41 : vector<8x64xf32>
    %cst_26 = arith.constant dense<0.000000e+00> : vector<64xf32>
    %47 = vector.multi_reduction <add>, %46, %cst_26 [0] : vector<8x64xf32> to vector<64xf32>
    %48 = vector.shape_cast %47 : vector<64xf32> to vector<1x64xf32>
    %cst_27 = arith.constant 8.000000e+00 : f32
    %49 = vector.broadcast %cst_27 : f32 to vector<1x64xf32>
    %50 = arith.divf %48, %49 : vector<1x64xf32>
    %51 = arith.mulf %45, %45 : vector<1x64xf32>
    %52 = arith.subf %50, %51 : vector<1x64xf32>
    %53 = vector.broadcast %45 : vector<1x64xf32> to vector<8x64xf32>
    %54 = arith.subf %41, %53 : vector<8x64xf32>
    %cst_28 = arith.constant 9.99999974E-6 : f32
    %55 = vector.broadcast %cst_28 : f32 to vector<1x64xf32>
    %56 = arith.addf %52, %55 : vector<1x64xf32>
    %57 = math.rsqrt %56 : vector<1x64xf32>
    %58 = vector.broadcast %57 : vector<1x64xf32> to vector<8x64xf32>
    %59 = arith.mulf %54, %58 : vector<8x64xf32>
    %60 = vector.broadcast %37 : vector<1x64xf32> to vector<8x64xf32>
    %61 = arith.mulf %59, %60 : vector<8x64xf32>
    %62 = vector.broadcast %38 : vector<1x64xf32> to vector<8x64xf32>
    %63 = arith.addf %61, %62 : vector<8x64xf32>
    %64 = arith.negf %63 : vector<8x64xf32>
    %65 = math.exp %64 : vector<8x64xf32>
    %cst_29 = arith.constant 1.000000e+00 : f32
    %66 = vector.broadcast %cst_29 : f32 to vector<8x64xf32>
    %67 = arith.addf %66, %65 : vector<8x64xf32>
    %68 = arith.divf %66, %67 : vector<8x64xf32>
    %69 = arith.mulf %63, %68 : vector<8x64xf32>
    %70 = arith.addf %69, %34 : vector<8x64xf32>
    %c0_30 = arith.constant 0 : index
    %c0_31 = arith.constant 0 : index
    %71 = vector.load %arg9[%c0_30, %c0_31] : memref<64x64xf32, #tpu.memory_space<vmem>>, vector<64x64xf32>
    %c0_32 = arith.constant 0 : index
    %c0_33 = arith.constant 0 : index
    %72 = vector.load %arg10[%c0_32, %c0_33] : memref<1x64xf32, #tpu.memory_space<vmem>>, vector<1x64xf32>
    %c0_34 = arith.constant 0 : index
    %c0_35 = arith.constant 0 : index
    %73 = vector.load %arg11[%c0_34, %c0_35] : memref<1x32xf32, #tpu.memory_space<vmem>>, vector<1x32xf32>
    %c0_36 = arith.constant 0 : index
    %c0_37 = arith.constant 0 : index
    %74 = vector.load %arg12[%c0_36, %c0_37] : memref<1x32xf32, #tpu.memory_space<vmem>>, vector<1x32xf32>
    %cst_38 = arith.constant dense<0.000000e+00> : vector<8x64xf32>
    %75 = tpu.matmul %70, %71, %cst_38 {dimension_numbers = #tpu.dot_dimension_numbers<[1], [0], [0], [1], [0, 0, 1, 1], [], []>} : vector<8x64xf32>, vector<64x64xf32>, vector<8x64xf32> -> vector<8x64xf32>
    %76 = vector.broadcast %72 : vector<1x64xf32> to vector<8x64xf32>
    %77 = arith.addf %75, %76 : vector<8x64xf32>
    %78 = vector.extract_strided_slice %77 {offsets = [0, 0], sizes = [8, 32], strides = [1, 1]} : vector<8x64xf32> to vector<8x32xf32>
    %cst_39 = arith.constant dense<0.000000e+00> : vector<32xf32>
    %79 = vector.multi_reduction <add>, %78, %cst_39 [0] : vector<8x32xf32> to vector<32xf32>
    %80 = vector.shape_cast %79 : vector<32xf32> to vector<1x32xf32>
    %cst_40 = arith.constant 8.000000e+00 : f32
    %81 = vector.broadcast %cst_40 : f32 to vector<1x32xf32>
    %82 = arith.divf %80, %81 : vector<1x32xf32>
    %83 = arith.mulf %78, %78 : vector<8x32xf32>
    %cst_41 = arith.constant dense<0.000000e+00> : vector<32xf32>
    %84 = vector.multi_reduction <add>, %83, %cst_41 [0] : vector<8x32xf32> to vector<32xf32>
    %85 = vector.shape_cast %84 : vector<32xf32> to vector<1x32xf32>
    %cst_42 = arith.constant 8.000000e+00 : f32
    %86 = vector.broadcast %cst_42 : f32 to vector<1x32xf32>
    %87 = arith.divf %85, %86 : vector<1x32xf32>
    %88 = arith.mulf %82, %82 : vector<1x32xf32>
    %89 = arith.subf %87, %88 : vector<1x32xf32>
    %90 = vector.broadcast %82 : vector<1x32xf32> to vector<8x32xf32>
    %91 = arith.subf %78, %90 : vector<8x32xf32>
    %cst_43 = arith.constant 9.99999974E-6 : f32
    %92 = vector.broadcast %cst_43 : f32 to vector<1x32xf32>
    %93 = arith.addf %89, %92 : vector<1x32xf32>
    %94 = math.rsqrt %93 : vector<1x32xf32>
    %95 = vector.broadcast %94 : vector<1x32xf32> to vector<8x32xf32>
    %96 = arith.mulf %91, %95 : vector<8x32xf32>
    %97 = vector.broadcast %73 : vector<1x32xf32> to vector<8x32xf32>
    %98 = arith.mulf %96, %97 : vector<8x32xf32>
    %99 = vector.broadcast %74 : vector<1x32xf32> to vector<8x32xf32>
    %100 = arith.addf %98, %99 : vector<8x32xf32>
    %101 = math.tanh %100 : vector<8x32xf32>
    %102 = vector.extract_strided_slice %77 {offsets = [0, 32], sizes = [8, 32], strides = [1, 1]} : vector<8x64xf32> to vector<8x32xf32>
    %103 = arith.addf %101, %102 : vector<8x32xf32>
    %c0_44 = arith.constant 0 : index
    %c0_45 = arith.constant 0 : index
    %104 = vector.load %arg13[%c0_44, %c0_45] : memref<8x32xf32, #tpu.memory_space<vmem>>, vector<8x32xf32>
    tpu.vector_store %arg13[%c0_44, %c0_45], %103 {strides = array<i32>} : memref<8x32xf32, #tpu.memory_space<vmem>>, vector<8x32xf32>,
    return
  }
}

</mosaic_0001>

<bundles_post_ra>
// kernel: configurable_nn_forward.1
= control target key start
LH: loop header
LB: loop body
LE: loop exit
PB: predicated region body
PF: predicated region fallthrough
CT: control target
= control target key end

     0   :  { %18 = vsyncpa [#allocation3], 0  ;;  %s905_s0 = inlined_call_operand.hbm [shape: f32[8,32], index: 0, kind: input, shape index: {}]   ;;  %s906_s1 = inlined_call_operand.hbm [shape: f32[32,128], index: 1, kind: input, shape index: {}]   ;;  %s907_s2 = inlined_call_operand.vmem [shape: f32[1,128], index: 2, kind: input, shape index: {}]   ;;  %s908_s3 = inlined_call_operand.vmem [shape: f32[1,64], index: 3, kind: input, shape index: {}]   ;;  %s909_s4 = inlined_call_operand.vmem [shape: f32[1,64], index: 4, kind: input, shape index: {}]   ;;  %s910_s5 = inlined_call_operand.hbm [shape: f32[64,64], index: 5, kind: input, shape index: {}]   ;;  %s911_s6 = inlined_call_operand.vmem [shape: f32[1,64], index: 6, kind: input, shape index: {}]   ;;  %s912_s7 = inlined_call_operand.vmem [shape: f32[1,64], index: 7, kind: input, shape index: {}]   ;;  %s913_s8 = inlined_call_operand.vmem [shape: f32[1,64], index: 8, kind: input, shape index: {}]   ;;  %s914_s9 = inlined_call_operand.hbm [shape: f32[64,64], index: 9, kind: input, shape index: {}]   ;;  %s915_s10 = inlined_call_operand.vmem [shape: f32[1,64], index: 10, kind: input, shape index: {}]   ;;  %s916_s11 = inlined_call_operand.vmem [shape: f32[1,32], index: 11, kind: input, shape index: {}]   ;;  %s917_s12 = inlined_call_operand.vmem [shape: f32[1,32], index: 12, kind: input, shape index: {}]   ;;  %s918_s13 = inlined_call_operand.hbm [shape: f32[8,32], index: 13, kind: output, shape index: {}]  }
   0x1   :  { %19 = vsyncpa [#allocation6], 0 }
   0x2   :  { %20 = vsyncpa [#allocation9], 0 }
   0x3   :  { %21 = vsyncpa [#allocation4], 0  ;;  %s733_s25 = smov [#allocation5]  }
   0x4   :  { %s37_s26 = sshll.u32 %s733_s25, 4  ;;  %s38_s26 = int_to_ptr.vmem [resolvable:$true] %s37_s26 }
   0x5   :  { %s633_s27 = scalar_lea.vmem %s38_s26, 512  ;;  %p638_p1 = scmp.lt.s32.totalorder %s38_s26, %s38_s26 }
   0x6   :  { %p634_p0 = scmp.ne.s32.totalorder %s38_s26, %s633_s27  ;;  %p639_p2 = scmp.lt.s32.totalorder %s633_s27, %s633_s27 }
   0x8   :  { %p640_p3 = por %p639_p2, %p638_p1 }
   0xa   :  { %p641_p4 = pnand %p640_p3, %p634_p0 }
   0xc   :  { %644 = shalt.err (!%p641_p4)
}
   0xd   :  { %s734_s28 = smov 128   ;;  %s735_s29 = smov 8  }
   0xe   :  { %43 = dma.hbm_to_vmem [thread:$0]  %s906_s1, 512, %s38_s26, [#allocation6], %s734_s28, %s734_s28, %s735_s29  }
   0xf   :  { %s736_s15 = smov [#allocation2]   ;;  %s737_s17 = smov [#allocation7]  }
  0x10   :  { %s28_s16 = sshll.u32 %s736_s15, 4  ;;  %s55_s18 = sshll.u32 %s737_s17, 4  ;;  %s29_s16 = int_to_ptr.vmem [resolvable:$true] %s28_s16  ;;  %s56_s18 = int_to_ptr.vmem [resolvable:$true] %s55_s18 }
  0x11   :  { %s653_s19 = scalar_lea.vmem %s29_s16, 128  ;;  %p658_p6 = scmp.lt.s32.totalorder %s29_s16, %s29_s16 }
  0x12   :  { %p654_p5 = scmp.ne.s32.totalorder %s29_s16, %s653_s19  ;;  %p659_p7 = scmp.lt.s32.totalorder %s653_s19, %s653_s19 }
  0x14   :  { %p660_p8 = por %p659_p7, %p658_p6 }
  0x16   :  { %p661_p9 = pnand %p660_p8, %p654_p5 }
  0x18   :  { %664 = shalt.err (!%p661_p9)
}
  0x19   :  { %31 = dma.hbm_to_vmem [thread:$0]  %s905_s0, 128, %s29_s16, [#allocation3]  }
  0x1a   :  { %s673_s22 = scalar_lea.vmem %s56_s18, 1024  ;;  %p678_p11 = scmp.lt.s32.totalorder %s56_s18, %s56_s18 }
  0x1b   :  { %p674_p10 = scmp.ne.s32.totalorder %s56_s18, %s673_s22  ;;  %p679_p12 = scmp.lt.s32.totalorder %s673_s22, %s673_s22 }
  0x1d   :  { %p680_p13 = por %p679_p12, %p678_p11 }
  0x1f   :  { %p681_p0 = pnand %p680_p13, %p674_p10 }
  0x21   :  { %684 = shalt.err (!%p681_p0)
}
  0x22   :  { %61 = dma.hbm_to_vmem [thread:$0]  %s910_s5, 1024, %s56_s18, [#allocation6], %s734_s28, %s734_s28, %s735_s29  }
  0x23   :  { %s738_s24 = smov [#allocation8]  }
  0x24   :  { %s73_s25 = sshll.u32 %s738_s24, 4  ;;  %s74_s25 = int_to_ptr.vmem [resolvable:$true] %s73_s25 }
  0x25   :  { %s693_s26 = scalar_lea.vmem %s74_s25, 1024  ;;  %p698_p2 = scmp.lt.s32.totalorder %s74_s25, %s74_s25 }
  0x26   :  { %p694_p1 = scmp.ne.s32.totalorder %s74_s25, %s693_s26  ;;  %p699_p3 = scmp.lt.s32.totalorder %s693_s26, %s693_s26 }
  0x28   :  { %p700_p4 = por %p699_p3, %p698_p2 }
  0x2a   :  { %p701_p5 = pnand %p700_p4, %p694_p1 }
  0x2c   :  { %704 = shalt.err (!%p701_p5)
}
  0x2d   :  { %79 = dma.hbm_to_vmem [thread:$0]  %s914_s9, 1024, %s74_s25, [#allocation9], %s734_s28, %s734_s28, %s735_s29  }
  0x2e   :  { %725 = dma.done.wait [#allocation3], 128  }
  0x2f   :  { %726 = vsyncadd [#allocation3], 4294967168 }
  0x30   :  { %727 = dma.done.wait [#allocation6], 1536  }
  0x31   :  { %728 = vsyncadd [#allocation6], 4294965760 }
  0x32   :  { %729 = dma.done.wait [#allocation9], 1024  }
  0x33   :  { %730 = vsyncadd [#allocation9], 4294966272  ;;  %v739_v0 = vmov 0.0   ;;  %vm740_vm0 = vmmov 0   ;;  %v102_v1 = vld [vmem:[#allocation5 + $0x18] sm:$0xff]  ;;  %v101_v2 = vld [vmem:[#allocation5 + $0x10] sm:$0xff] }
  0x34   :  { %553 = vmatprep.subr.mxu0 %v739_v0  ;;  %561 = vmatprep.mubr.msk.f32.mxu0 %vm740_vm0, %v739_v0  ;;  %v100_v3 = vld [vmem:[#allocation5 + $0x8] sm:$0xff]  ;;  %v99_v4 = vld [vmem:[#allocation5] sm:$0xff]  ;;  %v98_v5 = vld [vmem:[#allocation2] sm:$0xff]  ;;  %vm112_vm1 = vcmask 261120   ;;  %s741_s28 = smov 64   ;;  %vm186_vm2 = vcmask 523264  }
  0x35   :  { %564 = vmatprep.subr.mxu1 %v739_v0  ;;  %580 = vmatprep.mubr.msk.f32.mxu1 %vm740_vm0, %v739_v0  ;;  %v238_v6 = vld [vmem:[#allocation7 + $0x38] sm:$0xff]  ;;  %v237_v7 = vld [vmem:[#allocation7 + $0x30] sm:$0xff]  ;;  %v236_v8 = vld [vmem:[#allocation7 + $0x28] sm:$0xff]  ;;  %s743_s22 = smov [#allocation10]  }
  0x36   :  { %554 = vmatpush3.msra.mxu0 %v102_v1  ;;  %565 = vmatpush3.msra.mxu1 %v238_v6  ;;  %v235_v9 = vld [vmem:[#allocation7 + $0x20] sm:$0xff]  ;;  %v234_v10 = vld [vmem:[#allocation7 + $0x18] sm:$0xff]  ;;  %v233_v11 = vld [vmem:[#allocation7 + $0x10] sm:$0xff]  ;;  %s506_s1 = sshll.u32 %s743_s22, 4  ;;  %s507_s1 = int_to_ptr.vmem [resolvable:$true] %s506_s1 }
  0x37   :  { %555 = vmatprep.subr.mxu0 %v739_v0  ;;  %566 = vmatprep.subr.mxu1 %v739_v0  ;;  %v232_v12 = vld [vmem:[#allocation7 + $0x8] sm:$0xff]  ;;  %v231_v13 = vld [vmem:[#allocation7] sm:$0xff]  ;;  %v517_v14 = vld [vmem:[%s907_s2] ss:$0 sm:$0xff]  ;;  %s705_s23 = scalar_lea.vmem %s507_s1, 128  ;;  %p710_p7 = scmp.lt.s32.totalorder %s507_s1, %s507_s1 }
  0x38   :  { %556 = vmatpush3.msra.mxu0 %v101_v2  ;;  %567 = vmatpush3.msra.mxu1 %v237_v7  ;;  %v519_v41 = vld [vmem:[%s908_s3] ss:$0 sm:$0xff]  ;;  %v372_v49 = vld [vmem:[#allocation8 + $0x30] sm:$0xff]  ;;  %v371_v50 = vld [vmem:[#allocation8 + $0x28] sm:$0xff]  ;;  %p706_p6 = scmp.ne.s32.totalorder %s507_s1, %s705_s23  ;;  %p711_p8 = scmp.lt.s32.totalorder %s705_s23, %s705_s23 }
  0x39   :  { %557 = vmatprep.subr.mxu0 %v739_v0  ;;  %568 = vmatprep.subr.mxu1 %v739_v0  ;;  %v520_v43 = vld [vmem:[%s909_s4] ss:$0 sm:$0xff]  ;;  %v370_v51 = vld [vmem:[#allocation8 + $0x20] sm:$0xff]  ;;  %v368_v53 = vld [vmem:[#allocation8 + $0x10] sm:$0xff] }
  0x3a   :  { %558 = vmatpush3.msra.mxu0 %v100_v3  ;;  %569 = vmatpush3.msra.mxu1 %v236_v8  ;;  %v373_v48 = vld [vmem:[#allocation8 + $0x38] sm:$0xff]  ;;  %v367_v54 = vld [vmem:[#allocation8 + $0x8] sm:$0xff]  ;;  %v366_v55 = vld [vmem:[#allocation8] sm:$0xff]  ;;  %p712_p9 = por %p711_p8, %p710_p7 }
  0x3b   :  { %559 = vmatprep.subr.mxu0 %v739_v0  ;;  %570 = vmatprep.subr.mxu1 %v739_v0  ;;  %v369_v52 = vld [vmem:[#allocation8 + $0x18] sm:$0xff] }
  0x3c   :  { %560 = vmatpush3.msra.mxu0 %v99_v4  ;;  %571 = vmatpush3.msra.mxu1 %v235_v9  ;;  %v521_v56 = vld [vmem:[%s911_s6] ss:$0 sm:$0xff]  ;;  %p713_p10 = pnand %p712_p9, %p706_p6 }
  0x3d   :  { %562 = vmatmul.mubr.msk.f32.vlgmr.msra.gmra.mxu0 %vm112_vm1, %v98_v5  ;;  %583 = vmatprep.subr.mxu0 %v739_v0 }
  0x3e   :  { %599 = vmatprep.mubr.msk.f32.mxu0 %vm740_vm0, %v739_v0  ;;  %572 = vmatprep.subr.mxu1 %v739_v0 }
  0x3f   :  { %573 = vmatpush3.msra.mxu1 %v234_v10  ;;  %584 = vmatpush3.msra.mxu0 %v373_v48 }
  0x40   :  { %574 = vmatprep.subr.mxu1 %v739_v0  ;;  %585 = vmatprep.subr.mxu0 %v739_v0 }
  0x41   :  { %575 = vmatpush3.msra.mxu1 %v233_v11  ;;  %586 = vmatpush3.msra.mxu0 %v372_v49 }
  0x42   :  { %576 = vmatprep.subr.mxu1 %v739_v0  ;;  %587 = vmatprep.subr.mxu0 %v739_v0 }
  0x43   :  { %577 = vmatpush3.msra.mxu1 %v232_v12  ;;  %588 = vmatpush3.msra.mxu0 %v371_v50 }
  0x44   :  { %578 = vmatprep.subr.mxu1 %v739_v0  ;;  %589 = vmatprep.subr.mxu0 %v739_v0 }
  0x45   :  { %579 = vmatpush3.msra.mxu1 %v231_v13  ;;  %590 = vmatpush3.msra.mxu0 %v370_v51 }
  0x46   :  { %591 = vmatprep.subr.mxu0 %v739_v0 }
  0x47   :  { %592 = vmatpush3.msra.mxu0 %v369_v52 }
  0x48   :  { %593 = vmatprep.subr.mxu0 %v739_v0 }
  0x49   :  { %594 = vmatpush3.msra.mxu0 %v368_v53 }
  0x4a   :  { %595 = vmatprep.subr.mxu0 %v739_v0 }
  0x4b   :  { %596 = vmatpush3.msra.mxu0 %v367_v54 }
  0x4c   :  { %597 = vmatprep.subr.mxu0 %v739_v0 }
  0x4d   :  { %598 = vmatpush3.msra.mxu0 %v366_v55 }
  0xfd   :  { %v182_v15 = vpop.f32.mrf.mxu0 }
  0xfe   :  { %v183_v16 = vadd.f32 %v517_v14, %v182_v15 }
  0xff   :  { %v563_v17 = vpop.f32.mrf.mxu0 }
 0x100   :  { %227 = vrot.lane.b32.xlu0 %v183_v16, %s741_s28  ;;  %v187_v18 = vsel %vm186_vm2, %v183_v16, 0.0  ;;  %v196_v19 = vmul.f32 %v183_v16, %v183_v16 }
 0x101   :  { %v188_v20 = vrot.slane %v187_v18, 4 }
 0x102   :  { %v197_v21 = vsel %vm186_vm2, %v196_v19, 0.0 }
 0x103   :  { %v189_v22 = vadd.f32 %v188_v20, %v187_v18  ;;  %v198_v23 = vrot.slane %v197_v21, 4  ;;  %v523_v18 = vld [vmem:[%s912_s7] ss:$0 sm:$0xff] }
 0x104   :  { %v524_v20 = vld [vmem:[%s913_s8] ss:$0 sm:$0xff]  ;;  %s742_s8 = smov 96  }
 0x105   :  { %v190_v24 = vrot.slane %v189_v22, 2  ;;  %v199_v25 = vadd.f32 %v198_v23, %v197_v21 }
 0x107   :  { %v191_v26 = vadd.f32 %v190_v24, %v189_v22  ;;  %v200_v27 = vrot.slane %v199_v25, 2 }
 0x109   :  { %v192_v28 = vrot.slane %v191_v26, 1  ;;  %v201_v29 = vadd.f32 %v200_v27, %v199_v25 }
 0x10b   :  { %v193_v30 = vadd.f32 %v192_v28, %v191_v26  ;;  %v202_v31 = vrot.slane %v201_v29, 1 }
 0x10d   :  { %v195_v32 = vmul.f32 0.125, %v193_v30  ;;  %v203_v33 = vadd.f32 %v202_v31, %v201_v29  ;;  %v526_v29 = vld [vmem:[%s915_s10] ss:$0 sm:$0xff] }
 0x10f   :  { %v204_v34 = vmul.f32 0.125, %v203_v33  ;;  %v205_v35 = vmul.f32 %v195_v32, %v195_v32  ;;  %v207_v39 = vsub.f32 %v183_v16, %v195_v32 }
 0x111   :  { %v206_v36 = vsub.f32 %v204_v34, %v205_v35 }
 0x113   :  { %v208_v37 = vadd.f32 1e-05, %v206_v36 }
 0x115   :  { %613 = vrsqrt.f32 %v208_v37 }
 0x122   :  { %v614_v38 = vpop.eup %613 }
 0x123   :  { %v210_v40 = vmul.f32 %v614_v38, %v207_v39 }
 0x125   :  { %v217_v42 = vmul.f32 %v519_v41, %v210_v40 }
 0x127   :  { %v224_v44 = vadd.f32 %v520_v43, %v217_v42 }
 0x129   :  { %v225_v45 = vmax.f32 %v224_v44, 0.0 }
 0x172   :  { %v228_v46 = vpop.permute.xlu0 %227 }
 0x173   :  { %v866_v47 = vadd.f32 %v228_v46, %v225_v45 }
 0x175   :  { %581 = vmatmul.mubr.msk.f32.vlgmr.msra.gmra.mxu1 %vm186_vm2, %v866_v47 }
 0x235   :  { %v317_v57 = vpop.f32.mrf.mxu1 }
 0x236   :  { %v318_v58 = vadd.f32 %v521_v56, %v317_v57  ;;  %v528_v56 = vld [vmem:[%s916_s11] ss:$0 sm:$0xff] }
 0x237   :  { %v582_v59 = vpop.f32.mrf.mxu1 }
 0x238   :  { %v321_v60 = vsel %vm186_vm2, %v318_v58, 0.0  ;;  %v329_v61 = vmul.f32 %v318_v58, %v318_v58 }
 0x239   :  { %v322_v62 = vrot.slane %v321_v60, 4 }
 0x23a   :  { %v330_v63 = vsel %vm186_vm2, %v329_v61, 0.0 }
 0x23b   :  { %v323_v1 = vadd.f32 %v322_v62, %v321_v60  ;;  %v331_v2 = vrot.slane %v330_v63, 4 }
 0x23d   :  { %v324_v3 = vrot.slane %v323_v1, 2  ;;  %v332_v4 = vadd.f32 %v331_v2, %v330_v63 }
 0x23f   :  { %v325_v5 = vadd.f32 %v324_v3, %v323_v1  ;;  %v333_v0 = vrot.slane %v332_v4, 2 }
 0x241   :  { %v326_v6 = vrot.slane %v325_v5, 1  ;;  %v334_v7 = vadd.f32 %v333_v0, %v332_v4 }
 0x243   :  { %v327_v8 = vadd.f32 %v326_v6, %v325_v5  ;;  %v335_v9 = vrot.slane %v334_v7, 1 }
 0x245   :  { %v328_v10 = vmul.f32 0.125, %v327_v8  ;;  %v336_v11 = vadd.f32 %v335_v9, %v334_v7 }
 0x247   :  { %v337_v12 = vmul.f32 0.125, %v336_v11  ;;  %v338_v13 = vmul.f32 %v328_v10, %v328_v10  ;;  %v340_v16 = vsub.f32 %v318_v58, %v328_v10  ;;  %v529_v58 = vld [vmem:[%s917_s12] ss:$0 sm:$0xff] }
 0x249   :  { %v339_v14 = vsub.f32 %v337_v12, %v338_v13 }
 0x24b   :  { %v341_v15 = vadd.f32 1e-05, %v339_v14 }
 0x24d   :  { %615 = vrsqrt.f32 %v341_v15 }
 0x25a   :  { %v616_v17 = vpop.eup %615 }
 0x25b   :  { %v343_v19 = vmul.f32 %v616_v17, %v340_v16 }
 0x25d   :  { %v350_v21 = vmul.f32 %v523_v18, %v343_v19 }
 0x25f   :  { %v357_v22 = vadd.f32 %v524_v20, %v350_v21 }
 0x261   :  { %v525_v23 = vmul.f32 -1.442695, %v357_v22 }
 0x263   :  { %617 = vpow2.f32 %v525_v23 }
 0x270   :  { %v618_v24 = vpop.eup %617 }
 0x271   :  { %v361_v25 = vadd.f32 1.0, %v618_v24 }
 0x273   :  { %619 = vrcp.f32 %v361_v25 }
 0x280   :  { %v620_v26 = vpop.eup %619 }
 0x281   :  { %v364_v27 = vmul.f32 %v620_v26, %v357_v22 }
 0x283   :  { %v365_v28 = vadd.f32 %v364_v27, %v866_v47 }
 0x285   :  { %600 = vmatmul.mubr.msk.f32.vlgmr.msra.gmra.mxu0 %vm186_vm2, %v365_v28 }
 0x345   :  { %v452_v30 = vpop.f32.mrf.mxu0 }
 0x346   :  { %v453_v31 = vadd.f32 %v526_v29, %v452_v30 }
 0x347   :  { %v601_v32 = vpop.f32.mrf.mxu0 }
 0x348   :  { %495 = vrot.lane.b32.xlu0 %v453_v31, %s742_s8  ;;  %v456_v33 = vsel %vm112_vm1, %v453_v31, 0.0  ;;  %v464_v34 = vmul.f32 %v453_v31, %v453_v31 }
 0x349   :  { %v457_v35 = vrot.slane %v456_v33, 4 }
 0x34a   :  { %v465_v36 = vsel %vm112_vm1, %v464_v34, 0.0 }
 0x34b   :  { %v458_v37 = vadd.f32 %v457_v35, %v456_v33  ;;  %v466_v38 = vrot.slane %v465_v36, 4 }
 0x34d   :  { %v459_v39 = vrot.slane %v458_v37, 2  ;;  %v467_v40 = vadd.f32 %v466_v38, %v465_v36 }
 0x34f   :  { %v460_v41 = vadd.f32 %v459_v39, %v458_v37  ;;  %v468_v42 = vrot.slane %v467_v40, 2 }
 0x351   :  { %v461_v43 = vrot.slane %v460_v41, 1  ;;  %v469_v44 = vadd.f32 %v468_v42, %v467_v40 }
 0x353   :  { %v462_v45 = vadd.f32 %v461_v43, %v460_v41  ;;  %v470_v46 = vrot.slane %v469_v44, 1 }
 0x355   :  { %v463_v47 = vmul.f32 0.125, %v462_v45  ;;  %v471_v48 = vadd.f32 %v470_v46, %v469_v44 }
 0x357   :  { %v472_v49 = vmul.f32 0.125, %v471_v48  ;;  %v473_v50 = vmul.f32 %v463_v47, %v463_v47  ;;  %v475_v54 = vsub.f32 %v453_v31, %v463_v47 }
 0x359   :  { %v474_v51 = vsub.f32 %v472_v49, %v473_v50 }
 0x35b   :  { %v476_v52 = vadd.f32 1e-05, %v474_v51 }
 0x35d   :  { %621 = vrsqrt.f32 %v476_v52 }
 0x36a   :  { %v622_v53 = vpop.eup %621 }
 0x36b   :  { %v478_v55 = vmul.f32 %v622_v53, %v475_v54 }
 0x36d   :  { %v485_v57 = vmul.f32 %v528_v56, %v478_v55 }
 0x36f   :  { %v492_v59 = vadd.f32 %v529_v58, %v485_v57 }
 0x371   :  { %623 = vtanh.f32 %v492_v59 }
 0x37e   :  { %v624_v60 = vpop.eup %623 }
 0x3ba   :  { %v496_v61 = vpop.permute.xlu0 %495 }
 0x3bb   :  { %v498_v62 = vadd.f32 %v624_v60, %v496_v61 }
 0x3bd   :  { %499 = vst.msk [vmem:[#allocation10] sm:$0xff] %vm112_vm1, %v498_v62 }
 0x3be   :  { %716 = shalt.err (!%p713_p10)
}
 0x3bf   :  { %509 = dma.vmem_to_hbm [thread:$0]  %s507_s1, 128, %s918_s13, [#allocation4]  }
 0x3c0   :  { %731 = dma.done.wait [#allocation4], 128  }
 0x3c1   :  { %732 = vsyncadd [#allocation4], 4294967168 }
 0x3c2   :  { %513 = vsyncpa [#allocation3], 1 }
 0x3c3   :  { %514 = vsyncpa [#allocation6], 1 }
 0x3c4   :  { %515 = vsyncpa [#allocation9], 1 }
 0x3c5   :  { %516 = vsyncpa [#allocation4], 1 }

</bundles_post_ra>
